<compile_context>
chip_gen: v5e
topology: v5e:2x2
jax: 0.10.0
libtpu: 0.0.40
codegen_flags: <defaults>
</compile_context>

<pallas_src>
import jax
import jax.numpy as jnp
import numpy as np
from jax import lax
from jax.experimental import pallas as pl
from jax.experimental.pallas import tpu as pltpu

R_CONST = 1.0
M_CONST = 1.0
L_CONST = 1.0

# u = 0.5/R * (1/(m*L^2)) * sum_i W1[i, 1]  -- coefficient folded to one Python float.
COEF = 0.5 / R_CONST * (1.0 / (M_CONST * L_CONST ** 2))


def optimal_control_kernel(w1_ref, u_ref):
    # w1_ref: full (15, 4) f32 fc1 weight in VMEM (PyTorch [out, in] layout).
    # dV/dx_1 = sum_i W1[i, 1];  u = COEF * dV/dx_1.
    # Column 1 is selected with a lane-axis iota mask (VPU, free slot), then a
    # single cross-lane/sublane XLU reduction; scalar store into SMEM.
    w1 = w1_ref[...]
    lane = lax.broadcasted_iota(jnp.int32, w1.shape, 1)
    col1 = jnp.where(lane == 1, w1, jnp.zeros_like(w1))
    u_ref[0, 0] = COEF * jnp.sum(col1)


def optimal_control(x, w1, b1):
    """x: (2,) state.  w1: (15, 4) fc1 weight (PyTorch layout).  b1: (15,) bias.

    x and b1 are accepted for interface fidelity with the PyTorch module but do
    not influence u: the x**2 branch is detached and the VJP of a linear layer
    w.r.t. its input involves only the weight.  Returns a (1, 1) f32 array
    holding the scalar control u (no post-call slice op; index on the host if
    a 0-d value is needed).
    """
    del x, b1  # dead w.r.t. the returned control (see header derivation)
    return pl.pallas_call(
        optimal_control_kernel,
        out_shape=jax.ShapeDtypeStruct((1, 1), jnp.float32),
        in_specs=[pl.BlockSpec(memory_space=pltpu.MemorySpace.VMEM)],
        out_specs=pl.BlockSpec(memory_space=pltpu.MemorySpace.SMEM),
    )(w1)


def _init_linear(key, out_features, in_features):
    # PyTorch nn.Linear default init: U(-1/sqrt(in), 1/sqrt(in)) for W and b.
    kw, kb = jax.random.split(key)
    bound = 1.0 / np.sqrt(in_features)
    w = jax.random.uniform(kw, (out_features, in_features), jnp.float32, -bound, bound)
    b = jax.random.uniform(kb, (out_features,), jnp.float32, -bound, bound)
    return w, b


if __name__ == "__main__":
    key = jax.random.PRNGKey(0)
    k_x, k1, k2, k3 = jax.random.split(key, 4)

    # Critic parameters (deterministic synthetic init).
    w1, b1 = _init_linear(k1, 15, 4)   # fc1 (in_features adjusted 2 -> 4, see header)
    w2, b2 = _init_linear(k2, 8, 15)   # fc2 -- declared but unused in forward
    w3, b3 = _init_linear(k3, 1, 8)    # fc3 -- declared but unused in forward

    # State vector x (length-2, as Critic expects).
    x = jax.random.normal(k_x, (2,), jnp.float32)

    u = optimal_control(x, w1, b1)
    u = jax.block_until_ready(u)

    # Pure-JAX reference of the same semantics.
    u_ref = COEF * jnp.sum(w1[:, 1])
    np.testing.assert_allclose(np.asarray(u)[0, 0], np.asarray(u_ref),
                               rtol=1e-5, atol=1e-5)

    print("KERNEL_OK")
</pallas_src>

<mosaic_0001>
module attributes {stable_mosaic.version = 11 : i64} {
  func.func @optimal_control_kernel(%arg0: memref<15x4xf32, #tpu.memory_space<vmem>>, %arg1: memref<1x1xf32, #tpu.memory_space<smem>>) attributes {dimension_semantics = [], scalar_prefetch = 0 : i64, scratch_operands = 0 : i64, tpu.core_type = #tpu.core_type<tc>} {
    %c0 = arith.constant 0 : index
    %c0_0 = arith.constant 0 : index
    %0 = vector.load %arg0[%c0, %c0_0] : memref<15x4xf32, #tpu.memory_space<vmem>>, vector<15x4xf32>
    %1 = tpu.iota {dimensions = array<i32: 1>} : vector<15x4xi32>
    %c1_i32 = arith.constant 1 : i32
    %2 = vector.broadcast %c1_i32 : i32 to vector<15x4xi32>
    %3 = arith.cmpi eq, %1, %2 : vector<15x4xi32>
    %cst = arith.constant 0.000000e+00 : f32
    %4 = vector.broadcast %cst : f32 to vector<15x4xf32>
    %5 = arith.select %3, %0, %4 : vector<15x4xi1>, vector<15x4xf32>
    %6 = vector.shape_cast %5 : vector<15x4xf32> to vector<1x15x4xf32>
    %cst_1 = arith.constant dense<0.000000e+00> : vector<1xf32>
    %7 = vector.multi_reduction <add>, %6, %cst_1 [1, 2] : vector<1x15x4xf32> to vector<1xf32>
    %8 = vector.shape_cast %7 : vector<1xf32> to vector<1x1x1xf32>
    %9 = vector.extract %8[0, 0, 0] : f32 from vector<1x1x1xf32>
    %cst_2 = arith.constant 5.000000e-01 : f32
    %10 = arith.mulf %cst_2, %9 : f32
    %c0_3 = arith.constant 0 : index
    %c0_4 = arith.constant 0 : index
    %11 = memref.load %arg1[%c0_3, %c0_4] : memref<1x1xf32, #tpu.memory_space<smem>>
    memref.store %10, %arg1[%c0_3, %c0_4] : memref<1x1xf32, #tpu.memory_space<smem>>
    return
  }
}

</mosaic_0001>

<bundles_post_ra>
// kernel: tpu_custom_call.1
= control target key start
LH: loop header
LB: loop body
LE: loop exit
PB: predicated region body
PF: predicated region fallthrough
CT: control target
= control target key end

     0   :  { %v11_v0 = vlaneseq  ;;  %s85_s0 = inlined_call_operand.vmem [shape: f32[15,4], index: 0, kind: input, shape index: {}]   ;;  %s86_s1 = inlined_call_operand.hbm [shape: f32[1,1], index: 1, kind: output, shape index: {}]  }
   0x1   :  { %6 = vsyncpa [#allocation3], 0  ;;  %v9_v1 = vld [vmem:[%s85_s0] sm:$0xff]  ;;  %v10_v2 = vld [vmem:[%s85_s0 + $0x8] sm:$0x7f]  ;;  %vm16_vm0 = vcmask 31744  }
   0x2   :  { %v12_v3 = vand.u32 127, %v11_v0  ;;  %vm18_vm1 = vcmask 30720   ;;  %s38_s11 = sshll.u32 %s86_s1, 4  ;;  %s65_s14 = smov [#allocation2]   ;;  %s39_s11 = int_to_ptr.hbm [resolvable:$true] %s38_s11 }
   0x4   :  { %vm13_vm2 = vcmp.eq.s32.totalorder %v12_v3, 1 }
   0x5   :  { %v14_v4 = vsel %vm13_vm2, %v9_v1, 0.0  ;;  %v15_v5 = vsel %vm13_vm2, %v10_v2, 0.0 }
   0x6   :  { %v17_v6 = vsel %vm16_vm0, %v14_v4, 0.0  ;;  %v19_v7 = vsel %vm18_vm1, %v15_v5, 0.0 }
   0x7   :  { %v20_v8 = vadd.f32 %v19_v7, %v17_v6 }
   0x9   :  { %21 = vadd.xlane.f32.xlu0 %v20_v8 }
  0x7c   :  { %v22_v9 = vpop.xlane.xlu0 %21 }
  0x7d   :  { %v23_v10 = vrot.slane %v22_v9, 4 }
  0x7f   :  { %v24_v11 = vadd.f32 %v23_v10, %v22_v9 }
  0x81   :  { %v25_v12 = vrot.slane %v24_v11, 2 }
  0x83   :  { %v26_v13 = vadd.f32 %v25_v12, %v24_v11 }
  0x85   :  { %v27_v14 = vrot.slane %v26_v13, 1 }
  0x87   :  { %v28_v15 = vadd.f32 %v27_v14, %v26_v13 }
  0x89   :  { %48 = vpush %v28_v15 }
  0xba   :  { %s49_s12 = spop %48 }
  0xbb   :  { %s30_s13 = smul.f32 0.5, %s49_s12 }
  0xbd   :  { %32 = sst [smem:[#allocation2]] %s30_s13 }
  0xbe   :  { %41 = dma.smem_to_hbm %s65_s14, 16, %s39_s11, [#allocation3]  }
  0xbf   :  { %63 = dma.done.wait [#allocation3], 16  }
  0xc0   :  { %64 = vsyncadd [#allocation3], 4294967280 }
  0xc1   :  { %46 = sfence }
  0xc2   :  { %47 = vsyncpa [#allocation3], 1 }

</bundles_post_ra>
